<compile_context>
chip_gen: v6e
topology: v6e:2x2x1
jax: 0.10.0
libtpu: 0.0.40
codegen_flags: <defaults>
</compile_context>

<pallas_src>
import functools

import jax
import jax.numpy as jnp
from jax import lax
from jax.experimental import pallas as pl
from jax.experimental.pallas import tpu as pltpu


def _round_up(x: int, m: int) -> int:
    return ((x + m - 1) // m) * m


# Contract each operand's last axis:  (bm, k) x (n, k) -> (bm, n)  ==  x @ W^T.
_DN = (((1,), (1,)), ((), ()))


def mlp_kernel(x_ref, w1_ref, b1_ref, w2_ref, b2_ref, w3_ref, b3_ref, o_ref):
    # x tile: (bm, in) f32 in the caller's native layout; cast to bf16 for the MXU
    # here (no separate XLA cast pass over HBM).
    xb = x_ref[...].astype(jnp.bfloat16)

    # Layer 1: (bm, in) @ (64, in)^T -> (bm, 64), f32 accumulation on the MXU.
    h1 = lax.dot_general(xb, w1_ref[...], _DN, preferred_element_type=jnp.float32)
    h1 = jnp.maximum(h1 + b1_ref[...], 0.0)          # f32 bias + ReLU on the VPU

    # Layer 2: (bm, 64) @ (32, 64)^T -> (bm, 32).
    h2 = lax.dot_general(h1.astype(jnp.bfloat16), w2_ref[...], _DN,
                         preferred_element_type=jnp.float32)
    h2 = jnp.maximum(h2 + b2_ref[...], 0.0)

    # Layer 3 (no activation): (bm, 32) @ (out, 32)^T -> (bm, out), native-layout store.
    o = lax.dot_general(h2.astype(jnp.bfloat16), w3_ref[...], _DN,
                        preferred_element_type=jnp.float32)
    o_ref[...] = (o + b3_ref[...]).astype(o_ref.dtype)


def _jax_forward(x, params):
    """Plain-JAX path (small-batch fallback / correctness reference), same
    bf16-operand / f32-accumulation recipe as the kernel."""
    w1, b1, w2, b2, w3, b3 = params
    xb = x.astype(jnp.float32).astype(jnp.bfloat16)
    h1 = lax.dot_general(xb, w1, _DN, preferred_element_type=jnp.float32) + b1
    h1 = jnp.maximum(h1, 0.0)
    h2 = lax.dot_general(h1.astype(jnp.bfloat16), w2, _DN,
                         preferred_element_type=jnp.float32) + b2
    h2 = jnp.maximum(h2, 0.0)
    return lax.dot_general(h2.astype(jnp.bfloat16), w3, _DN,
                           preferred_element_type=jnp.float32) + b3


@functools.partial(jax.jit, static_argnames=("block_m", "min_pallas_batch"))
def neural_net_forward(x, params, *, block_m: int = 4096, min_pallas_batch: int = 1024):
    """Forward pass of NeuralNet: relu(l1(x)) -> relu(l2) -> l3.

    x: (batch, input_size).  Returns (batch, output_size) float32.
    """
    w1, b1, w2, b2, w3, b3 = params
    batch, in_size = x.shape
    out_size = w3.shape[0]

    # Matches the PyTorch module's x.type(torch.float32); no-op if already f32.
    x = x.astype(jnp.float32)

    # Small-batch fallback: pallas_call launch + padding overhead beats the fused
    # kernel below ~1-2K rows.
    if batch < min_pallas_batch:
        return _jax_forward(x, params)

    # ---- batch tiling -------------------------------------------------------
    # Pad only to a 128-lane multiple, then split into grid steps so that:
    #   * per-step tiles are large (amortize ~0.35 us/step grid overhead),
    #   * the grid has >= 2 steps whenever there are >= 2 batch tiles
    #     ("parallel" axis can shard across v7x's two TensorCores),
    #   * over-padding is bounded by (num_steps - 1) * 128 rows.
    padded128 = _round_up(batch, 128)
    tiles = padded128 // 128
    num_steps = max(pl.cdiv(padded128, block_m), min(2, tiles))
    bm = 128 * pl.cdiv(tiles, num_steps)
    padded = bm * num_steps

    if padded != batch:
        x = jnp.pad(x, ((0, padded - batch), (0, 0)))

    resident = lambda i: (0, 0)   # weights/biases: same block every step -> VMEM-resident

    flops = 2 * padded * (in_size * 64 + 64 * 32 + 32 * out_size)
    bytes_accessed = (padded * in_size * 4 + padded * out_size * 4
                      + (64 * in_size + 32 * 64 + out_size * 32) * 2
                      + (64 + 32 + out_size) * 4)

    out = pl.pallas_call(
        mlp_kernel,
        out_shape=jax.ShapeDtypeStruct((padded, out_size), jnp.float32),
        grid=(num_steps,),
        in_specs=[
            pl.BlockSpec((bm, in_size), lambda i: (i, 0)),   # x, tiled over batch
            pl.BlockSpec(w1.shape, resident),                # (64, in)   bf16
            pl.BlockSpec(b1.shape, resident),                # (1, 64)    f32
            pl.BlockSpec(w2.shape, resident),                # (32, 64)   bf16
            pl.BlockSpec(b2.shape, resident),                # (1, 32)    f32
            pl.BlockSpec(w3.shape, resident),                # (out, 32)  bf16
            pl.BlockSpec(b3.shape, resident),                # (1, out)   f32
        ],
        out_specs=pl.BlockSpec((bm, out_size), lambda i: (i, 0)),
        compiler_params=pltpu.CompilerParams(
            # Megacore sharding of the batch axis on v7x; no-op on v5e/v6e.
            # Default Buffered(2) pipelining is enough: tiles are large so DMA hides.
            dimension_semantics=("parallel",),
        ),
        cost_estimate=pl.CostEstimate(
            flops=int(flops), transcendentals=0, bytes_accessed=int(bytes_accessed)),
    )(x, w1, b1, w2, b2, w3, b3)

    # Drop padded rows; already in (batch, out) layout — no wrapper transpose.
    return out[:batch]


def init_params(key, input_size, output_size):
    """Mirror the PyTorch module: xavier_normal_ weights (stored (out, in), bf16 for
    the MXU), default nn.Linear uniform biases (stored (1, out), f32)."""
    def xavier_normal(k, fan_in, fan_out):
        std = (2.0 / (fan_in + fan_out)) ** 0.5
        w = std * jax.random.normal(k, (fan_out, fan_in), dtype=jnp.float32)
        return w.astype(jnp.bfloat16)

    def bias_init(k, fan_in, fan_out):
        bound = 1.0 / (fan_in ** 0.5)
        return jax.random.uniform(k, (1, fan_out), dtype=jnp.float32,
                                  minval=-bound, maxval=bound)

    ks = jax.random.split(key, 6)
    w1 = xavier_normal(ks[0], input_size, 64)
    b1 = bias_init(ks[1], input_size, 64)
    w2 = xavier_normal(ks[2], 64, 32)
    b2 = bias_init(ks[3], 64, 32)
    w3 = xavier_normal(ks[4], 32, output_size)
    b3 = bias_init(ks[5], 32, output_size)
    return (w1, b1, w2, b2, w3, b3)


if __name__ == "__main__":
    input_size = 32
    output_size = 8
    batch = 200   # non-multiple of 128: exercises padding + a 2-step grid (bm=128)

    key = jax.random.PRNGKey(0)
    k_params, k_x = jax.random.split(key)
    params = init_params(k_params, input_size, output_size)
    x = jax.random.normal(k_x, (batch, input_size), dtype=jnp.float32)

    # Force the Pallas path (the small-batch fallback would otherwise handle batch=200).
    out = neural_net_forward(x, params, min_pallas_batch=0)
    out = jax.block_until_ready(out)

    ref = _jax_forward(x, params)
    assert out.shape == (batch, output_size)
    assert jnp.allclose(out, ref, atol=1e-3, rtol=1e-3), (
        f"max abs err {jnp.max(jnp.abs(out - ref))}")

    # Default dispatch for this small batch takes the plain-JAX fallback; must agree too.
    out_fallback = jax.block_until_ready(neural_net_forward(x, params))
    assert jnp.allclose(out_fallback, ref, atol=1e-3, rtol=1e-3)

    print("KERNEL_OK")
</pallas_src>

<mosaic_0001>
module attributes {stable_mosaic.version = 11 : i64} {
  func.func @mlp_kernel(%arg0: i32, %arg1: memref<128x32xf32, #tpu.memory_space<vmem>>, %arg2: memref<64x32xbf16, #tpu.memory_space<vmem>>, %arg3: memref<1x64xf32, #tpu.memory_space<vmem>>, %arg4: memref<32x64xbf16, #tpu.memory_space<vmem>>, %arg5: memref<1x32xf32, #tpu.memory_space<vmem>>, %arg6: memref<8x32xbf16, #tpu.memory_space<vmem>>, %arg7: memref<1x8xf32, #tpu.memory_space<vmem>>, %arg8: memref<128x8xf32, #tpu.memory_space<vmem>>) attributes {dimension_semantics = [#tpu.dimension_semantics<parallel>], iteration_bounds = array<i64: 2>, scalar_prefetch = 0 : i64, scratch_operands = 0 : i64, tpu.core_type = #tpu.core_type<tc>, window_params = [{transform_indices = @transform_0, window_bounds = array<i64: 128, 32>}, {pipeline_mode = #tpu.pipeline_mode<synchronous>, transform_indices = @transform_1, window_bounds = array<i64: 64, 32>}, {pipeline_mode = #tpu.pipeline_mode<synchronous>, transform_indices = @transform_2, window_bounds = array<i64: 1, 64>}, {pipeline_mode = #tpu.pipeline_mode<synchronous>, transform_indices = @transform_3, window_bounds = array<i64: 32, 64>}, {pipeline_mode = #tpu.pipeline_mode<synchronous>, transform_indices = @transform_4, window_bounds = array<i64: 1, 32>}, {pipeline_mode = #tpu.pipeline_mode<synchronous>, transform_indices = @transform_5, window_bounds = array<i64: 8, 32>}, {pipeline_mode = #tpu.pipeline_mode<synchronous>, transform_indices = @transform_6, window_bounds = array<i64: 1, 8>}, {transform_indices = @transform_7, window_bounds = array<i64: 128, 8>}]} {
    %c0 = arith.constant 0 : index
    %c0_0 = arith.constant 0 : index
    %0 = vector.load %arg1[%c0, %c0_0] : memref<128x32xf32, #tpu.memory_space<vmem>>, vector<128x32xf32>
    %1 = arith.truncf %0 : vector<128x32xf32> to vector<128x32xbf16>
    %c0_1 = arith.constant 0 : index
    %c0_2 = arith.constant 0 : index
    %2 = vector.load %arg2[%c0_1, %c0_2] : memref<64x32xbf16, #tpu.memory_space<vmem>>, vector<64x32xbf16>
    %cst = arith.constant dense<0.000000e+00> : vector<128x64xf32>
    %3 = tpu.matmul %1, %2, %cst {dimension_numbers = #tpu.dot_dimension_numbers<[1], [1], [0], [0], [0, 0, 1, 0], [], []>} : vector<128x32xbf16>, vector<64x32xbf16>, vector<128x64xf32> -> vector<128x64xf32>
    %c0_3 = arith.constant 0 : index
    %c0_4 = arith.constant 0 : index
    %4 = vector.load %arg3[%c0_3, %c0_4] : memref<1x64xf32, #tpu.memory_space<vmem>>, vector<1x64xf32>
    %5 = vector.broadcast %4 : vector<1x64xf32> to vector<128x64xf32>
    %6 = arith.addf %3, %5 : vector<128x64xf32>
    %cst_5 = arith.constant 0.000000e+00 : f32
    %7 = vector.broadcast %cst_5 : f32 to vector<128x64xf32>
    %8 = arith.maximumf %6, %7 : vector<128x64xf32>
    %9 = arith.truncf %8 : vector<128x64xf32> to vector<128x64xbf16>
    %c0_6 = arith.constant 0 : index
    %c0_7 = arith.constant 0 : index
    %10 = vector.load %arg4[%c0_6, %c0_7] : memref<32x64xbf16, #tpu.memory_space<vmem>>, vector<32x64xbf16>
    %cst_8 = arith.constant dense<0.000000e+00> : vector<128x32xf32>
    %11 = tpu.matmul %9, %10, %cst_8 {dimension_numbers = #tpu.dot_dimension_numbers<[1], [1], [0], [0], [0, 0, 1, 0], [], []>} : vector<128x64xbf16>, vector<32x64xbf16>, vector<128x32xf32> -> vector<128x32xf32>
    %c0_9 = arith.constant 0 : index
    %c0_10 = arith.constant 0 : index
    %12 = vector.load %arg5[%c0_9, %c0_10] : memref<1x32xf32, #tpu.memory_space<vmem>>, vector<1x32xf32>
    %13 = vector.broadcast %12 : vector<1x32xf32> to vector<128x32xf32>
    %14 = arith.addf %11, %13 : vector<128x32xf32>
    %cst_11 = arith.constant 0.000000e+00 : f32
    %15 = vector.broadcast %cst_11 : f32 to vector<128x32xf32>
    %16 = arith.maximumf %14, %15 : vector<128x32xf32>
    %17 = arith.truncf %16 : vector<128x32xf32> to vector<128x32xbf16>
    %c0_12 = arith.constant 0 : index
    %c0_13 = arith.constant 0 : index
    %18 = vector.load %arg6[%c0_12, %c0_13] : memref<8x32xbf16, #tpu.memory_space<vmem>>, vector<8x32xbf16>
    %cst_14 = arith.constant dense<0.000000e+00> : vector<128x8xf32>
    %19 = tpu.matmul %17, %18, %cst_14 {dimension_numbers = #tpu.dot_dimension_numbers<[1], [1], [0], [0], [0, 0, 1, 0], [], []>} : vector<128x32xbf16>, vector<8x32xbf16>, vector<128x8xf32> -> vector<128x8xf32>
    %c0_15 = arith.constant 0 : index
    %c0_16 = arith.constant 0 : index
    %20 = vector.load %arg7[%c0_15, %c0_16] : memref<1x8xf32, #tpu.memory_space<vmem>>, vector<1x8xf32>
    %21 = vector.broadcast %20 : vector<1x8xf32> to vector<128x8xf32>
    %22 = arith.addf %19, %21 : vector<128x8xf32>
    %c0_17 = arith.constant 0 : index
    %c0_18 = arith.constant 0 : index
    %23 = vector.load %arg8[%c0_17, %c0_18] : memref<128x8xf32, #tpu.memory_space<vmem>>, vector<128x8xf32>
    tpu.vector_store %arg8[%c0_17, %c0_18], %22 {strides = array<i32>} : memref<128x8xf32, #tpu.memory_space<vmem>>, vector<128x8xf32>,
    return
  }
  func.func @transform_0(%arg0: i32) -> (i32, i32) {
    %c0_i32 = arith.constant 0 : i32
    %c0_i32_0 = arith.constant 0 : i32
    return %arg0, %c0_i32 : i32, i32
  }
  func.func @transform_1(%arg0: i32) -> (i32, i32) {
    %c0_i32 = arith.constant 0 : i32
    %c0_i32_0 = arith.constant 0 : i32
    %c0_i32_1 = arith.constant 0 : i32
    return %c0_i32, %c0_i32_0 : i32, i32
  }
  func.func @transform_2(%arg0: i32) -> (i32, i32) {
    %c0_i32 = arith.constant 0 : i32
    %c0_i32_0 = arith.constant 0 : i32
    %c0_i32_1 = arith.constant 0 : i32
    return %c0_i32, %c0_i32_0 : i32, i32
  }
  func.func @transform_3(%arg0: i32) -> (i32, i32) {
    %c0_i32 = arith.constant 0 : i32
    %c0_i32_0 = arith.constant 0 : i32
    %c0_i32_1 = arith.constant 0 : i32
    return %c0_i32, %c0_i32_0 : i32, i32
  }
  func.func @transform_4(%arg0: i32) -> (i32, i32) {
    %c0_i32 = arith.constant 0 : i32
    %c0_i32_0 = arith.constant 0 : i32
    %c0_i32_1 = arith.constant 0 : i32
    return %c0_i32, %c0_i32_0 : i32, i32
  }
  func.func @transform_5(%arg0: i32) -> (i32, i32) {
    %c0_i32 = arith.constant 0 : i32
    %c0_i32_0 = arith.constant 0 : i32
    %c0_i32_1 = arith.constant 0 : i32
    return %c0_i32, %c0_i32_0 : i32, i32
  }
  func.func @transform_6(%arg0: i32) -> (i32, i32) {
    %c0_i32 = arith.constant 0 : i32
    %c0_i32_0 = arith.constant 0 : i32
    %c0_i32_1 = arith.constant 0 : i32
    return %c0_i32, %c0_i32_0 : i32, i32
  }
  func.func @transform_7(%arg0: i32) -> (i32, i32) {
    %c0_i32 = arith.constant 0 : i32
    %c0_i32_0 = arith.constant 0 : i32
    return %arg0, %c0_i32 : i32, i32
  }
}

</mosaic_0001>

<bundles_post_ra>
// kernel: neural_net_forward.1
= control target key start
LH: loop header
LB: loop body
LE: loop exit
PB: predicated region body
PF: predicated region fallthrough
CT: control target
= control target key end

     0   :  { %s1090_s24 = smov 0   ;;  %s1236_s0 = inlined_call_operand.vmem [shape: f32[256,32], index: 0, kind: input, shape index: {}]   ;;  %s1237_s1 = inlined_call_operand.vmem [shape: bf16[64,32], index: 1, kind: input, shape index: {}]   ;;  %s1238_s2 = inlined_call_operand.vmem [shape: f32[1,64], index: 2, kind: input, shape index: {}]   ;;  %s1239_s3 = inlined_call_operand.vmem [shape: bf16[32,64], index: 3, kind: input, shape index: {}]   ;;  %s1240_s4 = inlined_call_operand.vmem [shape: f32[1,32], index: 4, kind: input, shape index: {}]   ;;  %s1241_s5 = inlined_call_operand.vmem [shape: bf16[8,32], index: 5, kind: input, shape index: {}]   ;;  %s1242_s6 = inlined_call_operand.vmem [shape: f32[1,8], index: 6, kind: input, shape index: {}]   ;;  %s1243_s7 = inlined_call_operand.vmem [shape: f32[256,8], index: 7, kind: output, shape index: {}]  }
   0x1 LB: > { %s878_s25 = sadd.s32 4294967295, %s1048_s24   ;;  %p882_p0 = scmp.ge.s32.totalorder %s1048_s24, 1  ;;  %s1048_s24 = sphi %s1090_s24, %s17_s24  }
   0x2   : > { %p238_p1 = scmp.lt.s32.totalorder %s1048_s24, 3 }
   0x4   : > { %p239_p2 = pnand %p882_p0, %p238_p1 }
   0x5   : > { %s883_s30 = sshll.u32 (!%p239_p2), %s878_s25, 4 }
   0x6   : > { %242 = sbr.rel (%p239_p2) target bundleno = 682 (0x2aa), region = 48  ;;  %p271_p3 = scmp.lt.s32.totalorder (!%p239_p2), %s883_s30, 31 }
   0xb   : > { %v1036_v0 = vld [vmem:[%s1237_s1 + $0x18] sm:$0xff]   ;;  %vm342_vm0 = vcmask 261120   ;;  %v1037_v1 = vld [vmem:[%s1237_s1 + $0x10] sm:$0xff]   ;;  %v1040_v3 = vld [vmem:[%s1239_s3 + $0x8] sm:$0xff]   ;;  %vm521_vm1 = vcmask 523264   ;;  %s1245_s30 = smov (!%p271_p3, %s883_s30), 31 }
   0xc   : > { %1019 = vmatprep.subr.msk.bf16.mxu0 %vm342_vm0, %v1036_v0  ;;  %v377_v2 = vsel %vm342_vm0, %v1036_v0, 0  ;;  %v550_v4 = vsel %vm521_vm1, %v1040_v3, 0  ;;  %v1041_v5 = vld [vmem:[%s1239_s3] sm:$0xff]   ;;  %1024 = vmatprep.subr.msk.bf16.mxu1 %vm521_vm1, %v1040_v3  ;;  %v374_v6 = vsel %vm342_vm0, %v1037_v1, 0  ;;  %v1038_v7 = vld [vmem:[%s1237_s1 + $0x8] sm:$0xff]   ;;  %s884_s14 = sshll.u32 %s1245_s30, 3 }
   0xd   : > { %954 = vmatpush3.bf16.xpose.msra.mxu0 %v377_v2  ;;  %1017 = vmatpush3.bf16.xpose.msra.mxu1 %v550_v4  ;;  %s1127_s17 = scalar_lea.vmem %s1236_s0, %s884_s14  ;;  %v547_v11 = vsel %vm521_vm1, %v1041_v5, 0  ;;  %v371_v12 = vsel %vm342_vm0, %v1038_v7, 0  ;;  %v1039_v13 = vld [vmem:[%s1237_s1] sm:$0xff]   ;;  %s1199_s9 = scalar_lea.vmem %s1243_s7, %s884_s14  ;;  %vm805_vm2 = vcmask 64512  }
   0xe   : > { %1020 = vmatprep.subr.msk.bf16.mxu0 %vm342_vm0, %v1037_v1  ;;  %1026 = vmatprep.subr.msk.bf16.mxu1 %vm521_vm1, %v1041_v5  ;;  %v283_v8 = vld [vmem:[%s1127_s17] sm:$0xff]  ;;  %v284_v9 = vld [vmem:[%s1127_s17 + $0x8] sm:$0xff]  ;;  %v368_v14 = vsel %vm342_vm0, %v1039_v13, 0  ;;  %v285_v15 = vld [vmem:[%s1127_s17 + $0x10] sm:$0xff] }
   0xf   : > { %v299_v10 = vpack.c.bf16 %v284_v9, %v283_v8  ;;  %v286_v16 = vld [vmem:[%s1127_s17 + $0x18] sm:$0xff]  ;;  %v287_v17 = vld [vmem:[%s1127_s17 + $0x20] sm:$0xff]  ;;  %v288_v18 = vld [vmem:[%s1127_s17 + $0x28] sm:$0xff] }
  0x10   : > { %v300_v19 = vpack.c.bf16 %v286_v16, %v285_v15  ;;  %v301_v20 = vpack.c.bf16 %v288_v18, %v287_v17  ;;  %v289_v21 = vld [vmem:[%s1127_s17 + $0x30] sm:$0xff]  ;;  %v290_v22 = vld [vmem:[%s1127_s17 + $0x38] sm:$0xff]  ;;  %v291_v23 = vld [vmem:[%s1127_s17 + $0x40] sm:$0xff] }
  0x11   : > { %961 = vmatprep.mubr.msk.bf16.mxu0 %vm342_vm0, %v299_v10  ;;  %v292_v24 = vld [vmem:[%s1127_s17 + $0x48] sm:$0xff]  ;;  %v302_v25 = vpack.c.bf16 %v290_v22, %v289_v21  ;;  %v293_v27 = vld [vmem:[%s1127_s17 + $0x50] sm:$0xff]  ;;  %v294_v28 = vld [vmem:[%s1127_s17 + $0x58] sm:$0xff] }
  0x12   : > { %v303_v26 = vpack.c.bf16 %v292_v24, %v291_v23  ;;  %v295_v29 = vld [vmem:[%s1127_s17 + $0x60] sm:$0xff]  ;;  %v296_v30 = vld [vmem:[%s1127_s17 + $0x68] sm:$0xff]  ;;  %v304_v31 = vpack.c.bf16 %v294_v28, %v293_v27  ;;  %v297_v33 = vld [vmem:[%s1127_s17 + $0x70] sm:$0xff] }
  0x13   : > { %v305_v32 = vpack.c.bf16 %v296_v30, %v295_v29  ;;  %v298_v34 = vld [vmem:[%s1127_s17 + $0x78] sm:$0xff]  ;;  %v673_v36 = vld [vmem:[%s1241_s5] sm:$0xf] }
  0x14   : > { %v306_v35 = vpack.c.bf16 %v298_v34, %v297_v33  ;;  %v887_v39 = vld [vmem:[%s1238_s2] ss:$0 sm:$0xff] }
  0x15   : > { %956 = vmatpush3.bf16.xpose.msra.mxu0 %v374_v6  ;;  %1018 = vmatpush3.bf16.xpose.msra.mxu1 %v547_v11  ;;  %v900_v33 = vld [vmem:[%s1240_s4] ss:$0 sm:$0xff] }
  0x16   : > { %1021 = vmatprep.subr.msk.bf16.mxu0 %vm342_vm0, %v1038_v7  ;;  %1027 = vmatprep.subr.msk.bf16.mxu1 %vm342_vm0, %v673_v36 }
  0x1d   : > { %958 = vmatpush3.bf16.xpose.msra.mxu0 %v371_v12 }
  0x1e   : > { %1022 = vmatprep.subr.msk.bf16.mxu0 %vm342_vm0, %v1039_v13 }
  0x25   : > { %960 = vmatpush3.bf16.xpose.msra.mxu0 %v368_v14 }
  0x26   : > { %1023 = vmatprep.subr.msk.bf16.mxu0 %vm521_vm1, %v1040_v3 }
  0x2c   : > { %962 = vmatmul.mubr.msk.bf16.vlgmr.msra.gmra.mxu0 %vm342_vm0, %v300_v19 }
  0x2d   : > { %965 = vmatprep.mubr.msk.bf16.mxu0 %vm342_vm0, %v301_v20  ;;  %978 = vmatpush3.bf16.xpose.msra.mxu0 %v550_v4 }
  0x2e   : > { %1025 = vmatprep.subr.msk.bf16.mxu0 %vm521_vm1, %v1041_v5  ;;  %v706_v5 = vsel %vm342_vm0, %v673_v36, 0 }
  0x34   : > { %966 = vmatmul.mubr.msk.bf16.gmra.mxu0 %vm342_vm0, %v302_v25 }
  0x35   : > { %969 = vmatprep.mubr.msk.bf16.mxu0 %vm342_vm0, %v303_v26  ;;  %980 = vmatpush3.bf16.xpose.msra.mxu0 %v547_v11 }
  0x3c   : > { %970 = vmatmul.mubr.msk.bf16.gmra.mxu0 %vm342_vm0, %v304_v31 }
  0x3d   : > { %973 = vmatprep.mubr.msk.bf16.mxu0 %vm342_vm0, %v305_v32 }
  0x44   : > { %974 = vmatmul.mubr.msk.bf16.gmra.mxu0 %vm342_vm0, %v306_v35 }
  0xec   : > { %v963_v37 = vpop.f32.mrf.mxu0 }
  0xed   : > { %v422_v43 = vadd.f32 %v963_v37, %v887_v39 }
  0xee   : > { %v413_v38 = vpop.f32.mrf.mxu0 }
  0xef   : > { %v414_v41 = vadd.f32 %v887_v39, %v413_v38  ;;  %v478_v50 = vmax.f32 %v422_v43, 0.0 }
  0xf0   : > { %v964_v40 = vpop.f32.mrf.mxu0 }
  0xf1   : > { %v425_v42 = vadd.f32 %v964_v40, %v887_v39  ;;  %v476_v48 = vmax.f32 %v414_v41, 0.0 }
  0xf2   : > { %v416_v44 = vpop.f32.mrf.mxu0 }
  0xf3   : > { %v417_v45 = vadd.f32 %v887_v39, %v416_v44  ;;  %v479_v46 = vmax.f32 %v425_v42, 0.0 }
  0xf4   : > { %v967_v47 = vpop.f32.mrf.mxu0 }
  0xf5   : > { %v477_v49 = vmax.f32 %v417_v45, 0.0  ;;  %v493_v53 = vpack.c.bf16 %v479_v46, %v478_v50  ;;  %v438_v57 = vadd.f32 %v967_v47, %v887_v39 }
  0xf6   : > { %v429_v51 = vpop.f32.mrf.mxu0 }
  0xf7   : > { %v492_v52 = vpack.c.bf16 %v477_v49, %v476_v48  ;;  %v430_v55 = vadd.f32 %v887_v39, %v429_v51  ;;  %v482_v0 = vmax.f32 %v438_v57, 0.0 }
  0xf8   : > { %v968_v54 = vpop.f32.mrf.mxu0 }
  0xf9   : > { %v441_v56 = vadd.f32 %v968_v54, %v887_v39  ;;  %981 = vmatprep.mubr.msk.bf16.mxu0 %vm521_vm1, %v492_v52  ;;  %v480_v62 = vmax.f32 %v430_v55, 0.0 }
  0xfa   : > { %v432_v58 = vpop.f32.mrf.mxu0  ;;  %982 = vmatmul.mubr.msk.bf16.vlgmr.msra.gmra.mxu0 %vm521_vm1, %v493_v53 }
  0xfb   : > { %v433_v59 = vadd.f32 %v887_v39, %v432_v58  ;;  %v483_v60 = vmax.f32 %v441_v56, 0.0 }
  0xfc   : > { %v971_v61 = vpop.f32.mrf.mxu0 }
  0xfd   : > { %v481_v63 = vmax.f32 %v433_v59, 0.0  ;;  %v495_v3 = vpack.c.bf16 %v483_v60, %v482_v0  ;;  %v454_v8 = vadd.f32 %v971_v61, %v887_v39 }
  0xfe   : > { %v445_v1 = vpop.f32.mrf.mxu0 }
  0xff   : > { %v494_v2 = vpack.c.bf16 %v481_v63, %v480_v62  ;;  %v446_v6 = vadd.f32 %v887_v39, %v445_v1  ;;  %v486_v15 = vmax.f32 %v454_v8, 0.0 }
 0x100   : > { %v972_v4 = vpop.f32.mrf.mxu0 }
 0x101   : > { %v457_v7 = vadd.f32 %v972_v4, %v887_v39  ;;  %985 = vmatprep.mubr.msk.bf16.mxu1 %vm521_vm1, %v494_v2  ;;  %v484_v13 = vmax.f32 %v446_v6, 0.0 }
 0x102   : > { %v448_v9 = vpop.f32.mrf.mxu0  ;;  %986 = vmatmul.mubr.msk.bf16.vlgmr.msra.gmra.mxu1 %vm521_vm1, %v495_v3 }
 0x103   : > { %v449_v10 = vadd.f32 %v887_v39, %v448_v9  ;;  %998 = vmatpush3.bf16.xpose.msra.mxu1 %v706_v5  ;;  %v487_v11 = vmax.f32 %v457_v7, 0.0 }
 0x104   : > { %v975_v12 = vpop.f32.mrf.mxu0 }
 0x105   : > { %v485_v14 = vmax.f32 %v449_v10, 0.0  ;;  %v497_v18 = vpack.c.bf16 %v487_v11, %v486_v15  ;;  %v470_v22 = vadd.f32 %v975_v12, %v887_v39 }
 0x106   : > { %v461_v16 = vpop.f32.mrf.mxu0 }
 0x107   : > { %v496_v17 = vpack.c.bf16 %v485_v14, %v484_v13  ;;  %v462_v20 = vadd.f32 %v887_v39, %v461_v16  ;;  %v490_v28 = vmax.f32 %v470_v22, 0.0 }
 0x108   : > { %v976_v19 = vpop.f32.mrf.mxu0 }
 0x109   : > { %v473_v21 = vadd.f32 %v976_v19, %v887_v39  ;;  %989 = vmatprep.mubr.msk.bf16.mxu1 %vm521_vm1, %v496_v17  ;;  %v488_v26 = vmax.f32 %v462_v20, 0.0 }
 0x10a   : > { %v464_v23 = vpop.f32.mrf.mxu0  ;;  %990 = vmatmul.mubr.msk.bf16.gmra.mxu1 %vm521_vm1, %v497_v18 }
 0x10b   : > { %v465_v24 = vadd.f32 %v887_v39, %v464_v23  ;;  %v491_v25 = vmax.f32 %v473_v21, 0.0 }
 0x10d   : > { %v489_v27 = vmax.f32 %v465_v24, 0.0  ;;  %v499_v30 = vpack.c.bf16 %v491_v25, %v490_v28  ;;  %v911_v24 = vld [vmem:[%s1242_s6] ss:$0 sm:$0xff] }
 0x10f   : > { %v498_v29 = vpack.c.bf16 %v489_v27, %v488_v26 }
 0x111   : > { %993 = vmatprep.mubr.msk.bf16.mxu1 %vm521_vm1, %v498_v29 }
 0x112   : > { %994 = vmatmul.mubr.msk.bf16.gmra.mxu1 %vm521_vm1, %v499_v30 }
 0x1ba   : > { %v983_v31 = vpop.f32.mrf.mxu0 }
 0x1bb   : > { %v595_v37 = vadd.f32 %v983_v31, %v900_v33 }
 0x1bc   : > { %v586_v32 = vpop.f32.mrf.mxu0 }
 0x1bd   : > { %v587_v35 = vadd.f32 %v900_v33, %v586_v32  ;;  %v651_v44 = vmax.f32 %v595_v37, 0.0 }
 0x1be   : > { %v984_v34 = vpop.f32.mrf.mxu0 }
 0x1bf   : > { %v598_v36 = vadd.f32 %v984_v34, %v900_v33  ;;  %v649_v42 = vmax.f32 %v587_v35, 0.0 }
 0x1c0   : > { %v589_v38 = vpop.f32.mrf.mxu0 }
 0x1c1   : > { %v590_v39 = vadd.f32 %v900_v33, %v589_v38  ;;  %v652_v40 = vmax.f32 %v598_v36, 0.0 }
 0x1c2   : > { %v987_v41 = vpop.f32.mrf.mxu1 }
 0x1c3   : > { %v650_v43 = vmax.f32 %v590_v39, 0.0  ;;  %v666_v47 = vpack.c.bf16 %v652_v40, %v651_v44  ;;  %v611_v51 = vadd.f32 %v987_v41, %v900_v33 }
 0x1c4   : > { %v602_v45 = vpop.f32.mrf.mxu1 }
 0x1c5   : > { %v665_v46 = vpack.c.bf16 %v650_v43, %v649_v42  ;;  %v603_v49 = vadd.f32 %v900_v33, %v602_v45  ;;  %v655_v58 = vmax.f32 %v611_v51, 0.0 }
 0x1c6   : > { %v988_v48 = vpop.f32.mrf.mxu1 }
 0x1c7   : > { %v614_v50 = vadd.f32 %v988_v48, %v900_v33  ;;  %999 = vmatprep.mubr.msk.bf16.mxu1 %vm342_vm0, %v665_v46  ;;  %v653_v56 = vmax.f32 %v603_v49, 0.0 }
 0x1c8   : > { %v605_v52 = vpop.f32.mrf.mxu1  ;;  %1000 = vmatmul.mubr.msk.bf16.vlgmr.msra.gmra.mxu1 %vm342_vm0, %v666_v47 }
 0x1c9   : > { %v606_v53 = vadd.f32 %v900_v33, %v605_v52  ;;  %v656_v54 = vmax.f32 %v614_v50, 0.0 }
 0x1ca   : > { %v991_v55 = vpop.f32.mrf.mxu1 }
 0x1cb   : > { %v654_v57 = vmax.f32 %v606_v53, 0.0  ;;  %v668_v61 = vpack.c.bf16 %v656_v54, %v655_v58  ;;  %v627_v1 = vadd.f32 %v991_v55, %v900_v33 }
 0x1cc   : > { %v618_v59 = vpop.f32.mrf.mxu1 }
 0x1cd   : > { %v667_v60 = vpack.c.bf16 %v654_v57, %v653_v56  ;;  %v619_v63 = vadd.f32 %v900_v33, %v618_v59  ;;  %v659_v8 = vmax.f32 %v627_v1, 0.0 }
 0x1ce   : > { %v992_v62 = vpop.f32.mrf.mxu1 }
 0x1cf   : > { %v630_v0 = vadd.f32 %v992_v62, %v900_v33  ;;  %1003 = vmatprep.mubr.msk.bf16.mxu1 %vm342_vm0, %v667_v60  ;;  %v657_v6 = vmax.f32 %v619_v63, 0.0 }
 0x1d0   : > { %v621_v2 = vpop.f32.mrf.mxu1  ;;  %1004 = vmatmul.mubr.msk.bf16.gmra.mxu1 %vm342_vm0, %v668_v61 }
 0x1d1   : > { %v622_v3 = vadd.f32 %v900_v33, %v621_v2  ;;  %v660_v4 = vmax.f32 %v630_v0, 0.0 }
 0x1d2   : > { %v995_v5 = vpop.f32.mrf.mxu1 }
 0x1d3   : > { %v658_v7 = vmax.f32 %v622_v3, 0.0  ;;  %v670_v11 = vpack.c.bf16 %v660_v4, %v659_v8  ;;  %v643_v15 = vadd.f32 %v995_v5, %v900_v33 }
 0x1d4   : > { %v634_v9 = vpop.f32.mrf.mxu1 }
 0x1d5   : > { %v669_v10 = vpack.c.bf16 %v658_v7, %v657_v6  ;;  %v635_v13 = vadd.f32 %v900_v33, %v634_v9  ;;  %v663_v21 = vmax.f32 %v643_v15, 0.0 }
 0x1d6   : > { %v996_v12 = vpop.f32.mrf.mxu1 }
 0x1d7   : > { %v646_v14 = vadd.f32 %v996_v12, %v900_v33  ;;  %1007 = vmatprep.mubr.msk.bf16.mxu1 %vm342_vm0, %v669_v10  ;;  %v661_v19 = vmax.f32 %v635_v13, 0.0 }
 0x1d8   : > { %v637_v16 = vpop.f32.mrf.mxu1  ;;  %1008 = vmatmul.mubr.msk.bf16.gmra.mxu1 %vm342_vm0, %v670_v11 }
 0x1d9   : > { %v638_v17 = vadd.f32 %v900_v33, %v637_v16  ;;  %v664_v18 = vmax.f32 %v646_v14, 0.0 }
 0x1db   : > { %v662_v20 = vmax.f32 %v638_v17, 0.0  ;;  %v672_v23 = vpack.c.bf16 %v664_v18, %v663_v21 }
 0x1dd   : > { %v671_v22 = vpack.c.bf16 %v662_v20, %v661_v19 }
 0x1df   : > { %1011 = vmatprep.mubr.msk.bf16.mxu1 %vm342_vm0, %v671_v22 }
 0x1e0   : > { %1012 = vmatmul.mubr.msk.bf16.gmra.mxu1 %vm342_vm0, %v672_v23 }
 0x288   : > { %v1001_v25 = vpop.f32.mrf.mxu1 }
 0x289   : > { %v751_v26 = vadd.f32 %v1001_v25, %v911_v24 }
 0x28a   : > { %v742_v27 = vpop.f32.mrf.mxu1 }
 0x28b   : > { %808 = vst.msk [vmem:[%s1199_s9 + $0x10] sm:$0xff] %vm805_vm2, %v751_v26  ;;  %v743_v28 = vadd.f32 %v911_v24, %v742_v27 }
 0x28c   : > { %v1002_v29 = vpop.f32.mrf.mxu1 }
 0x28d   : > { %806 = vst.msk [vmem:[%s1199_s9] sm:$0xff] %vm805_vm2, %v743_v28  ;;  %v754_v30 = vadd.f32 %v1002_v29, %v911_v24 }
 0x28e   : > { %v745_v31 = vpop.f32.mrf.mxu1 }
 0x28f   : > { %809 = vst.msk [vmem:[%s1199_s9 + $0x18] sm:$0xff] %vm805_vm2, %v754_v30  ;;  %v746_v32 = vadd.f32 %v911_v24, %v745_v31 }
 0x290   : > { %v1005_v33 = vpop.f32.mrf.mxu1 }
 0x291   : > { %807 = vst.msk [vmem:[%s1199_s9 + $0x8] sm:$0xff] %vm805_vm2, %v746_v32  ;;  %v767_v34 = vadd.f32 %v1005_v33, %v911_v24 }
 0x292   : > { %v758_v35 = vpop.f32.mrf.mxu1 }
 0x293   : > { %812 = vst.msk [vmem:[%s1199_s9 + $0x30] sm:$0xff] %vm805_vm2, %v767_v34  ;;  %v759_v36 = vadd.f32 %v911_v24, %v758_v35 }
 0x294   : > { %v1006_v37 = vpop.f32.mrf.mxu1 }
 0x295   : > { %810 = vst.msk [vmem:[%s1199_s9 + $0x20] sm:$0xff] %vm805_vm2, %v759_v36  ;;  %v770_v38 = vadd.f32 %v1006_v37, %v911_v24 }
 0x296   : > { %v761_v39 = vpop.f32.mrf.mxu1 }
 0x297   : > { %813 = vst.msk [vmem:[%s1199_s9 + $0x38] sm:$0xff] %vm805_vm2, %v770_v38  ;;  %v762_v40 = vadd.f32 %v911_v24, %v761_v39 }
 0x298   : > { %v1009_v41 = vpop.f32.mrf.mxu1 }
 0x299   : > { %811 = vst.msk [vmem:[%s1199_s9 + $0x28] sm:$0xff] %vm805_vm2, %v762_v40  ;;  %v783_v42 = vadd.f32 %v1009_v41, %v911_v24 }
 0x29a   : > { %v774_v43 = vpop.f32.mrf.mxu1 }
 0x29b   : > { %816 = vst.msk [vmem:[%s1199_s9 + $0x50] sm:$0xff] %vm805_vm2, %v783_v42  ;;  %v775_v44 = vadd.f32 %v911_v24, %v774_v43 }
 0x29c   : > { %v1010_v45 = vpop.f32.mrf.mxu1 }
 0x29d   : > { %814 = vst.msk [vmem:[%s1199_s9 + $0x40] sm:$0xff] %vm805_vm2, %v775_v44  ;;  %v786_v46 = vadd.f32 %v1010_v45, %v911_v24 }
 0x29e   : > { %v777_v47 = vpop.f32.mrf.mxu1 }
 0x29f   : > { %817 = vst.msk [vmem:[%s1199_s9 + $0x58] sm:$0xff] %vm805_vm2, %v786_v46  ;;  %v778_v48 = vadd.f32 %v911_v24, %v777_v47 }
 0x2a0   : > { %v1013_v49 = vpop.f32.mrf.mxu1 }
 0x2a1   : > { %815 = vst.msk [vmem:[%s1199_s9 + $0x48] sm:$0xff] %vm805_vm2, %v778_v48  ;;  %v799_v50 = vadd.f32 %v1013_v49, %v911_v24 }
 0x2a2   : > { %v790_v51 = vpop.f32.mrf.mxu1 }
 0x2a3   : > { %820 = vst.msk [vmem:[%s1199_s9 + $0x70] sm:$0xff] %vm805_vm2, %v799_v50  ;;  %v791_v52 = vadd.f32 %v911_v24, %v790_v51 }
 0x2a4   : > { %v1014_v53 = vpop.f32.mrf.mxu1 }
 0x2a5   : > { %818 = vst.msk [vmem:[%s1199_s9 + $0x60] sm:$0xff] %vm805_vm2, %v791_v52  ;;  %v802_v54 = vadd.f32 %v1014_v53, %v911_v24 }
 0x2a6   : > { %v793_v55 = vpop.f32.mrf.mxu1 }
 0x2a7   : > { %821 = vst.msk [vmem:[%s1199_s9 + $0x78] sm:$0xff] %vm805_vm2, %v802_v54  ;;  %v794_v56 = vadd.f32 %v911_v24, %v793_v55 }
 0x2a9   : > { %819 = vst.msk [vmem:[%s1199_s9 + $0x68] sm:$0xff] %vm805_vm2, %v794_v56 }
 0x2aa PF: > { %s17_s24 = sadd.s32 1, %s1048_s24  }
 0x2ab   : > { %p14_p4 = scmp.ge.s32.totalorder %s17_s24, 4  }
 0x2ad   :  { %16 = sbr.rel (!%p14_p4) target bundleno = 1 (0x1), region = 78 }

</bundles_post_ra>
